<compile_context>
chip_gen: v7x
topology: tpu7x:2x2x1
jax: 0.10.0
libtpu: 0.0.40
codegen_flags: <defaults>
</compile_context>

<pallas_src>
import jax
import jax.numpy as jnp
from jax.experimental import pallas as pl
from jax.experimental.pallas import tpu as pltpu

IN_FEATURES = 784


def _round_up(n, m):
    return (n + m - 1) // m * m


def _softplus(x):
    # Numerically stable softplus, matches torch.nn.Softplus (beta=1).
    return jnp.maximum(x, 0.0) + jnp.log1p(jnp.exp(-jnp.abs(x)))


def encoder_kernel(x_ref, w1_ref, b1_ref, wh_ref, bh_ref, out_ref):
    # x tile arrives in its native dtype (f32) straight from HBM; cast to bf16
    # on the VPU just before the MXU matmul (no separate XLA cast pass).
    x = x_ref[...].astype(jnp.bfloat16)                              # (tb, 784)
    h = jnp.dot(x, w1_ref[...], preferred_element_type=jnp.float32)  # (tb, H)
    h = _softplus(h + b1_ref[...])                                   # f32

    y = jnp.dot(h, wh_ref[...], preferred_element_type=jnp.float32) + bh_ref[...]
    z = y.shape[-1] // 2                                             # static Z

    # Columns [0, Z) -> z_loc (identity); columns [Z, 2Z) -> exp (z_scale).
    # 2Z is tiny (16 lanes), so the redundant exp over the loc half is free
    # (EUP slack) and one dense 2Z-wide store beats two masked sub-slices.
    col = jax.lax.broadcasted_iota(jnp.int32, y.shape, 1)
    out_ref[...] = jnp.where(col < z, y, jnp.exp(y)).astype(out_ref.dtype)


def prepare_params(params, *, fc1_dtype=jnp.bfloat16):
    """Cast / fuse the raw (pre-transposed) Linear params once. No K padding."""
    w1t, b1, w21t, b21, w22t, b22 = params
    H = w1t.shape[1]
    w1 = w1t.astype(fc1_dtype)                                       # (784, H)
    b1p = b1.reshape(1, H).astype(jnp.float32)
    # Fuse the two tiny heads into a single (H, 2Z) matmul (f32: it's tiny).
    wh = jnp.concatenate([w21t, w22t], axis=1).astype(jnp.float32)
    bh = jnp.concatenate([b21, b22], axis=0).reshape(1, -1).astype(jnp.float32)
    return w1, b1p, wh, bh


def _choose_tile_b(B, tile_b_max):
    # MXU-row-aligned batch tile; aim for >= 2 grid steps when the batch allows
    # so the "parallel" axis actually shards across v7x's two TensorCores.
    target = _round_up(max(1, (B + 1) // 2), 256)
    t = min(tile_b_max, target)
    t = min(t, _round_up(B, 8))          # never bigger than the 8-aligned batch
    return max(t, 8)


def encoder_forward(x, prepared, *, tile_b=2048):
    """x: any shape whose trailing dims flatten to 784 (e.g. NCHW (B,1,28,28))."""
    w1, b1p, wh, bh = prepared
    H = w1.shape[1]
    Z2 = wh.shape[1]
    Z = Z2 // 2

    x2d = x.reshape(-1, IN_FEATURES)     # metadata-only reshape (contiguous)
    B = x2d.shape[0]
    out_dtype = x2d.dtype

    tb = _choose_tile_b(B, tile_b)
    grid = (pl.cdiv(B, tb),)             # ragged last block: tail rows are
                                          # don't-care; Pallas masks their stores.
    const = lambda shape: pl.BlockSpec(shape, lambda i: (0, 0))  # VMEM-resident

    out = pl.pallas_call(
        encoder_kernel,
        out_shape=jax.ShapeDtypeStruct((B, Z2), out_dtype),
        grid_spec=pl.GridSpec(
            grid=grid,
            in_specs=[
                pl.BlockSpec((tb, IN_FEATURES), lambda i: (i, 0)),  # x tile (f32)
                const((IN_FEATURES, H)),                            # W1^T bf16
                const((1, H)),                                      # b1
                const((H, Z2)),                                     # [W21^T|W22^T]
                const((1, Z2)),                                     # [b21 | b22]
            ],
            out_specs=pl.BlockSpec((tb, Z2), lambda i: (i, 0)),
        ),
        compiler_params=pltpu.CompilerParams(
            dimension_semantics=("parallel",),      # megacore shard on batch
            vmem_limit_bytes=32 * 1024 * 1024,      # f32 2048x784 x-tile x 2 bufs
        ),
    )(x2d, w1, b1p, wh, bh)

    return out[:, :Z], out[:, Z:]


def init_params(key, hidden_dim, z_dim, dtype=jnp.float32):
    """nn.Linear-style init (uniform +/- 1/sqrt(fan_in)); weights pre-transposed
    to (in_features, out_features)."""
    ks = jax.random.split(key, 6)

    def lin(kw, kb, fan_in, fan_out):
        bound = 1.0 / jnp.sqrt(fan_in)
        w_t = jax.random.uniform(kw, (fan_in, fan_out), dtype, -bound, bound)
        b = jax.random.uniform(kb, (fan_out,), dtype, -bound, bound)
        return w_t, b

    w1t, b1 = lin(ks[0], ks[1], IN_FEATURES, hidden_dim)
    w21t, b21 = lin(ks[2], ks[3], hidden_dim, z_dim)
    w22t, b22 = lin(ks[4], ks[5], hidden_dim, z_dim)
    return (w1t, b1, w21t, b21, w22t, b22)


def reference_forward(x, params):
    """Pure-JAX f32 reference for correctness checking."""
    w1t, b1, w21t, b21, w22t, b22 = params
    x2d = x.reshape(-1, IN_FEATURES)
    h = jax.nn.softplus(x2d @ w1t + b1)
    z_loc = h @ w21t + b21
    z_scale = jnp.exp(h @ w22t + b22)
    return z_loc, z_scale


if __name__ == "__main__":
    key = jax.random.PRNGKey(0)
    k_x, k_p = jax.random.split(key)

    batch, hidden_dim, z_dim = 8, 32, 8
    # NCHW input, as the PyTorch module would receive (it reshapes to (-1, 784)).
    x = jax.random.normal(k_x, (batch, 1, 28, 28), dtype=jnp.float32)

    params = init_params(k_p, hidden_dim, z_dim)
    prepared = prepare_params(params)

    z_loc, z_scale = encoder_forward(x, prepared)
    jax.block_until_ready((z_loc, z_scale))

    # Sanity check against pure-JAX f32 reference (bf16 fc1 path -> looser tol).
    z_loc_ref, z_scale_ref = reference_forward(x, params)
    assert z_loc.shape == (batch, z_dim) and z_scale.shape == (batch, z_dim)
    assert jnp.allclose(z_loc, z_loc_ref, atol=2e-2, rtol=2e-2)
    assert jnp.allclose(z_scale, z_scale_ref, atol=2e-2, rtol=2e-2)

    print("KERNEL_OK")
</pallas_src>

<mosaic_0001>
module attributes {stable_mosaic.version = 11 : i64} {
  func.func @encoder_kernel(%arg0: i32, %arg1: memref<8x784xf32, #tpu.memory_space<vmem>>, %arg2: memref<784x32xbf16, #tpu.memory_space<vmem>>, %arg3: memref<1x32xf32, #tpu.memory_space<vmem>>, %arg4: memref<32x16xf32, #tpu.memory_space<vmem>>, %arg5: memref<1x16xf32, #tpu.memory_space<vmem>>, %arg6: memref<8x16xf32, #tpu.memory_space<vmem>>) attributes {dimension_semantics = [#tpu.dimension_semantics<parallel>], iteration_bounds = array<i64: 1>, scalar_prefetch = 0 : i64, scratch_operands = 0 : i64, tpu.core_type = #tpu.core_type<tc>, window_params = [{transform_indices = @transform_0, window_bounds = array<i64: 8, 784>}, {pipeline_mode = #tpu.pipeline_mode<synchronous>, transform_indices = @transform_1, window_bounds = array<i64: 784, 32>}, {pipeline_mode = #tpu.pipeline_mode<synchronous>, transform_indices = @transform_2, window_bounds = array<i64: 1, 32>}, {pipeline_mode = #tpu.pipeline_mode<synchronous>, transform_indices = @transform_3, window_bounds = array<i64: 32, 16>}, {pipeline_mode = #tpu.pipeline_mode<synchronous>, transform_indices = @transform_4, window_bounds = array<i64: 1, 16>}, {transform_indices = @transform_5, window_bounds = array<i64: 8, 16>}]} {
    %c0 = arith.constant 0 : index
    %c0_0 = arith.constant 0 : index
    %0 = vector.load %arg1[%c0, %c0_0] : memref<8x784xf32, #tpu.memory_space<vmem>>, vector<8x784xf32>
    %1 = arith.truncf %0 : vector<8x784xf32> to vector<8x784xbf16>
    %c0_1 = arith.constant 0 : index
    %c0_2 = arith.constant 0 : index
    %2 = vector.load %arg2[%c0_1, %c0_2] : memref<784x32xbf16, #tpu.memory_space<vmem>>, vector<784x32xbf16>
    %cst = arith.constant dense<0.000000e+00> : vector<8x32xf32>
    %3 = tpu.matmul %1, %2, %cst {dimension_numbers = #tpu.dot_dimension_numbers<[1], [0], [0], [1], [0, 0, 1, 1], [], []>} : vector<8x784xbf16>, vector<784x32xbf16>, vector<8x32xf32> -> vector<8x32xf32>
    %c0_3 = arith.constant 0 : index
    %c0_4 = arith.constant 0 : index
    %4 = vector.load %arg3[%c0_3, %c0_4] : memref<1x32xf32, #tpu.memory_space<vmem>>, vector<1x32xf32>
    %5 = vector.broadcast %4 : vector<1x32xf32> to vector<8x32xf32>
    %6 = arith.addf %3, %5 : vector<8x32xf32>
    %cst_5 = arith.constant 0.000000e+00 : f32
    %7 = vector.broadcast %cst_5 : f32 to vector<8x32xf32>
    %8 = arith.maximumf %6, %7 : vector<8x32xf32>
    %9 = math.absf %6 : vector<8x32xf32>
    %cst_6 = arith.constant 0.000000e+00 : f32
    %10 = vector.broadcast %cst_6 : f32 to vector<8x32xf32>
    %11 = arith.subf %10, %9 : vector<8x32xf32>
    %12 = math.exp %11 : vector<8x32xf32>
    %13 = math.log1p %12 : vector<8x32xf32>
    %14 = arith.addf %8, %13 : vector<8x32xf32>
    %c0_7 = arith.constant 0 : index
    %c0_8 = arith.constant 0 : index
    %15 = vector.load %arg4[%c0_7, %c0_8] : memref<32x16xf32, #tpu.memory_space<vmem>>, vector<32x16xf32>
    %cst_9 = arith.constant dense<0.000000e+00> : vector<8x16xf32>
    %16 = tpu.matmul %14, %15, %cst_9 {dimension_numbers = #tpu.dot_dimension_numbers<[1], [0], [0], [1], [0, 0, 1, 1], [], []>} : vector<8x32xf32>, vector<32x16xf32>, vector<8x16xf32> -> vector<8x16xf32>
    %c0_10 = arith.constant 0 : index
    %c0_11 = arith.constant 0 : index
    %17 = vector.load %arg5[%c0_10, %c0_11] : memref<1x16xf32, #tpu.memory_space<vmem>>, vector<1x16xf32>
    %18 = vector.broadcast %17 : vector<1x16xf32> to vector<8x16xf32>
    %19 = arith.addf %16, %18 : vector<8x16xf32>
    %20 = tpu.iota {dimensions = array<i32: 1>} : vector<8x16xi32>
    %c8_i32 = arith.constant 8 : i32
    %21 = vector.broadcast %c8_i32 : i32 to vector<8x16xi32>
    %22 = arith.cmpi slt, %20, %21 : vector<8x16xi32>
    %23 = math.exp %19 : vector<8x16xf32>
    %24 = arith.select %22, %19, %23 : vector<8x16xi1>, vector<8x16xf32>
    %c0_12 = arith.constant 0 : index
    %c0_13 = arith.constant 0 : index
    %25 = vector.load %arg6[%c0_12, %c0_13] : memref<8x16xf32, #tpu.memory_space<vmem>>, vector<8x16xf32>
    tpu.vector_store %arg6[%c0_12, %c0_13], %24 {strides = array<i32>} : memref<8x16xf32, #tpu.memory_space<vmem>>, vector<8x16xf32>,
    return
  }
  func.func @transform_0(%arg0: i32) -> (i32, i32) {
    %c0_i32 = arith.constant 0 : i32
    %c0_i32_0 = arith.constant 0 : i32
    return %arg0, %c0_i32 : i32, i32
  }
  func.func @transform_1(%arg0: i32) -> (i32, i32) {
    %c0_i32 = arith.constant 0 : i32
    %c0_i32_0 = arith.constant 0 : i32
    %c0_i32_1 = arith.constant 0 : i32
    return %c0_i32, %c0_i32_0 : i32, i32
  }
  func.func @transform_2(%arg0: i32) -> (i32, i32) {
    %c0_i32 = arith.constant 0 : i32
    %c0_i32_0 = arith.constant 0 : i32
    %c0_i32_1 = arith.constant 0 : i32
    return %c0_i32, %c0_i32_0 : i32, i32
  }
  func.func @transform_3(%arg0: i32) -> (i32, i32) {
    %c0_i32 = arith.constant 0 : i32
    %c0_i32_0 = arith.constant 0 : i32
    %c0_i32_1 = arith.constant 0 : i32
    return %c0_i32, %c0_i32_0 : i32, i32
  }
  func.func @transform_4(%arg0: i32) -> (i32, i32) {
    %c0_i32 = arith.constant 0 : i32
    %c0_i32_0 = arith.constant 0 : i32
    %c0_i32_1 = arith.constant 0 : i32
    return %c0_i32, %c0_i32_0 : i32, i32
  }
  func.func @transform_5(%arg0: i32) -> (i32, i32) {
    %c0_i32 = arith.constant 0 : i32
    %c0_i32_0 = arith.constant 0 : i32
    return %arg0, %c0_i32 : i32, i32
  }
}

</mosaic_0001>

<bundles_post_ra>
// kernel: tpu_custom_call.1
= control target key start
LH: loop header
LB: loop body
LE: loop exit
PB: predicated region body
PF: predicated region fallthrough
CT: control target
= control target key end

     0   :  { %v952_v44 = vmov 0.0   ;;  %vm953_vm0 = vmmov 0   ;;  %s1188_s0 = inlined_call_operand.vmem [shape: f32[8,784], index: 0, kind: input, shape index: {}]   ;;  %s1189_s1 = inlined_call_operand.vmem [shape: bf16[784,32], index: 1, kind: input, shape index: {}]   ;;  %s1190_s2 = inlined_call_operand.vmem [shape: f32[1,32], index: 2, kind: input, shape index: {}]   ;;  %s1191_s3 = inlined_call_operand.vmem [shape: f32[32,16], index: 3, kind: input, shape index: {}]   ;;  %s1192_s4 = inlined_call_operand.vmem [shape: f32[1,16], index: 4, kind: input, shape index: {}]   ;;  %s1193_s5 = inlined_call_operand.hbm [shape: f32[8,16], index: 5, kind: output, shape index: {}]  }
   0x1   :  { %v873_v0 = vld [vmem:[%s1189_s1 + $0x40] sm:$0xff]   ;;  %v877_v4 = vld [vmem:[%s1189_s1 + $0x48] sm:$0xff]   ;;  %v881_v8 = vld [vmem:[%s1189_s1 + $0x50] sm:$0xff]  }
   0x2   :  { %v874_v1 = vld [vmem:[%s1189_s1] sm:$0xff]   ;;  %773 = vmatprep.subr.bf16.mxu0 %v873_v0  ;;  %v878_v5 = vld [vmem:[%s1189_s1 + $0x8] sm:$0xff]   ;;  %v882_v9 = vld [vmem:[%s1189_s1 + $0x10] sm:$0xff]  }
   0x3   :  { %v875_v2 = vld [vmem:[%s1189_s1 + $0xc0] sm:$0xff]   ;;  %774 = vmatpush3.bf16.msra.mxu0 %v874_v1  ;;  %v879_v6 = vld [vmem:[%s1189_s1 + $0xc8] sm:$0xff]   ;;  %v883_v10 = vld [vmem:[%s1189_s1 + $0xd0] sm:$0xff]  }
   0x4   :  { %v876_v3 = vld [vmem:[%s1189_s1 + $0x80] sm:$0xff]   ;;  %795 = vmatprep.subr.bf16.mxu1 %v875_v2  ;;  %775 = vmatprep.subr.bf16.mxu0 %v877_v4  ;;  %v880_v7 = vld [vmem:[%s1189_s1 + $0x88] sm:$0xff]   ;;  %v884_v11 = vld [vmem:[%s1189_s1 + $0x90] sm:$0xff]  }
   0x5   :  { %796 = vmatpush3.bf16.msra.mxu1 %v876_v3  ;;  %v885_v12 = vld [vmem:[%s1189_s1 + $0x58] sm:$0xff]   ;;  %v889_v16 = vld [vmem:[%s1189_s1 + $0x60] sm:$0xff]   ;;  %v893_v20 = vld [vmem:[%s1189_s1 + $0x68] sm:$0xff]  }
   0x6   :  { %797 = vmatprep.subr.bf16.mxu1 %v879_v6  ;;  %v886_v13 = vld [vmem:[%s1189_s1 + $0x18] sm:$0xff]   ;;  %v890_v17 = vld [vmem:[%s1189_s1 + $0x20] sm:$0xff]   ;;  %v894_v21 = vld [vmem:[%s1189_s1 + $0x28] sm:$0xff]  }
   0x7   :  { %776 = vmatpush3.bf16.msra.mxu0 %v878_v5  ;;  %v887_v14 = vld [vmem:[%s1189_s1 + $0xd8] sm:$0xff]   ;;  %v891_v18 = vld [vmem:[%s1189_s1 + $0xe0] sm:$0xff]   ;;  %v895_v22 = vld [vmem:[%s1189_s1 + $0xe8] sm:$0xff]  }
   0x8   :  { %777 = vmatprep.subr.bf16.mxu0 %v881_v8  ;;  %v888_v15 = vld [vmem:[%s1189_s1 + $0x98] sm:$0xff]   ;;  %v892_v19 = vld [vmem:[%s1189_s1 + $0xa0] sm:$0xff]   ;;  %v896_v23 = vld [vmem:[%s1189_s1 + $0xa8] sm:$0xff]  }
   0x9   :  { %798 = vmatpush3.bf16.msra.mxu1 %v880_v7  ;;  %v897_v24 = vld [vmem:[%s1189_s1 + $0x70] sm:$0xff]   ;;  %v901_v28 = vld [vmem:[%s1189_s1 + $0x78] sm:$0xff]   ;;  %v23_v31 = vld [vmem:[%s1188_s0 + $0x8] sm:$0xff] }
   0xa   :  { %799 = vmatprep.subr.bf16.mxu1 %v883_v10  ;;  %v898_v25 = vld [vmem:[%s1189_s1 + $0x30] sm:$0xff]   ;;  %v902_v29 = vld [vmem:[%s1189_s1 + $0x38] sm:$0xff]   ;;  %v30_v32 = vpack.c.bf16 %v23_v31, %v23_v31  ;;  %v22_v34 = vld [vmem:[%s1188_s0] sm:$0xff] }
   0xb   :  { %778 = vmatpush3.bf16.msra.mxu0 %v882_v9  ;;  %v899_v26 = vld [vmem:[%s1189_s1 + $0xf0] sm:$0xff]   ;;  %v903_v30 = vld [vmem:[%s1189_s1 + $0xf8] sm:$0xff]   ;;  %v29_v35 = vpack.c.bf16 %v22_v34, %v22_v34  ;;  %v905_v36 = vld [vmem:[%s1189_s1 + $0x140] sm:$0xff]  }
   0xc   :  { %779 = vmatprep.subr.bf16.mxu0 %v885_v12  ;;  %v900_v27 = vld [vmem:[%s1189_s1 + $0xb0] sm:$0xff]   ;;  %v904_v33 = vld [vmem:[%s1189_s1 + $0xb8] sm:$0xff]   ;;  %471 = vmatprep.mubr.bf16.mxu0 %v30_v32  ;;  %v906_v39 = vld [vmem:[%s1189_s1 + $0x100] sm:$0xff]  }
   0xd   :  { %800 = vmatpush3.bf16.msra.mxu1 %v884_v11  ;;  %v25_v37 = vld [vmem:[%s1188_s0 + $0x18] sm:$0xff]  ;;  %v24_v40 = vld [vmem:[%s1188_s0 + $0x10] sm:$0xff]  ;;  %v907_v42 = vld [vmem:[%s1189_s1 + $0x148] sm:$0xff]  }
   0xe   :  { %801 = vmatprep.subr.bf16.mxu1 %v887_v14  ;;  %v32_v38 = vpack.c.bf16 %v25_v37, %v25_v37  ;;  %v31_v41 = vpack.c.bf16 %v24_v40, %v24_v40  ;;  %v908_v43 = vld [vmem:[%s1189_s1 + $0x108] sm:$0xff]   ;;  %v909_v45 = vld [vmem:[%s1189_s1 + $0x150] sm:$0xff]   ;;  %v911_v47 = vld [vmem:[%s1189_s1 + $0x158] sm:$0xff]  }
   0xf   :  { %780 = vmatpush3.bf16.msra.mxu0 %v886_v13  ;;  %v910_v46 = vld [vmem:[%s1189_s1 + $0x110] sm:$0xff]   ;;  %v912_v48 = vld [vmem:[%s1189_s1 + $0x118] sm:$0xff]   ;;  %v913_v49 = vld [vmem:[%s1189_s1 + $0x160] sm:$0xff]  }
  0x10   :  { %781 = vmatprep.subr.bf16.mxu0 %v889_v16  ;;  %511 = vmatprep.mubr.bf16.mxu1 %v32_v38  ;;  %v914_v50 = vld [vmem:[%s1189_s1 + $0x120] sm:$0xff]   ;;  %v915_v51 = vld [vmem:[%s1189_s1 + $0x168] sm:$0xff]   ;;  %v28_v55 = vld [vmem:[%s1188_s0 + $0x30] sm:$0xff] }
  0x11   :  { %802 = vmatpush3.bf16.msra.mxu1 %v888_v15  ;;  %v921_v52 = vld [vmem:[%s1189_s1 + $0x180] sm:$0xff]   ;;  %v27_v53 = vld [vmem:[%s1188_s0 + $0x28] sm:$0xff] }
  0x12   :  { %803 = vmatprep.subr.bf16.mxu1 %v891_v18  ;;  %v34_v54 = vpack.c.bf16 %v27_v53, %v27_v53 }
  0x13   :  { %782 = vmatpush3.bf16.msra.mxu0 %v890_v17 }
  0x14   :  { %783 = vmatprep.subr.bf16.mxu0 %v893_v20 }
  0x15   :  { %804 = vmatpush3.bf16.msra.mxu1 %v892_v19 }
  0x16   :  { %805 = vmatprep.subr.bf16.mxu1 %v895_v22 }
  0x17   :  { %784 = vmatpush3.bf16.msra.mxu0 %v894_v21 }
  0x18   :  { %785 = vmatprep.subr.bf16.mxu0 %v897_v24 }
  0x19   :  { %806 = vmatpush3.bf16.msra.mxu1 %v896_v23 }
  0x1a   :  { %807 = vmatprep.subr.bf16.mxu1 %v899_v26 }
  0x1b   :  { %786 = vmatpush3.bf16.msra.mxu0 %v898_v25 }
  0x1c   :  { %787 = vmatprep.subr.bf16.mxu0 %v901_v28 }
  0x1d   :  { %808 = vmatpush3.bf16.msra.mxu1 %v900_v27 }
  0x1e   :  { %809 = vmatprep.subr.bf16.mxu1 %v903_v30 }
  0x1f   :  { %788 = vmatpush3.bf16.msra.mxu0 %v902_v29 }
  0x20   :  { %817 = vmatprep.subr.bf16.mxu0 %v905_v36 }
  0x21   :  { %810 = vmatpush3.bf16.msra.mxu1 %v904_v33 }
  0x22   :  { %472 = vmatmul.mubr.bf16.vlgmr.msra.gmra.mrb[0].mxu0 %v29_v35  ;;  %846 = vmatprep.subr.bf16.mxu1 %v952_v44 }
  0x23   :  { %818 = vmatpush3.bf16.msra.mxu0 %v906_v39 }
  0x24   :  { %512 = vmatmul.mubr.bf16.vlgmr.msra.gmra.mrb[0].mxu1 %v31_v41  ;;  %819 = vmatprep.subr.bf16.mxu0 %v907_v42 }
  0x25   :  { %848 = vmatprep.mubr.msk.bf16.mxu1 %vm953_vm0, %v952_v44 }
  0x27   :  { %820 = vmatpush3.bf16.msra.mxu0 %v908_v43 }
  0x28   :  { %821 = vmatprep.subr.bf16.mxu0 %v909_v45 }
  0x2b   :  { %822 = vmatpush3.bf16.msra.mxu0 %v910_v46 }
  0x2c   :  { %823 = vmatprep.subr.bf16.mxu0 %v911_v47 }
  0x2f   :  { %824 = vmatpush3.bf16.msra.mxu0 %v912_v48 }
  0x30   :  { %825 = vmatprep.subr.bf16.mxu0 %v913_v49 }
  0x31   :  { %10 = vsyncpa [#allocation3], 0  ;;  %v916_v56 = vld [vmem:[%s1189_s1 + $0x128] sm:$0xff]   ;;  %847 = vmatpush3.bf16.msra.mxu1 %v921_v52  ;;  %v35_v57 = vpack.c.bf16 %v28_v55, %v28_v55  ;;  %vm435_vm1 = vcmask 130048   ;;  %v917_v58 = vld [vmem:[%s1189_s1 + $0x170] sm:$0xff]   ;;  %551 = vmatprep.mubr.bf16.mxu0 %v34_v54  ;;  %v954_v3 = vmov 0.0|0.0  }
  0x32   :  { %v918_v59 = vld [vmem:[%s1189_s1 + $0x130] sm:$0xff]   ;;  %v919_v60 = vld [vmem:[%s1189_s1 + $0x178] sm:$0xff]   ;;  %v26_v62 = vld [vmem:[%s1188_s0 + $0x20] sm:$0xff]  ;;  %863 = vmatprep.subr.bf16.mxu1 %v954_v3  ;;  %vm625_vm3 = vcmask 261120   ;;  %s955_s13 = smov [#allocation2]  }
  0x33   :  { %826 = vmatpush3.bf16.msra.mxu0 %v914_v50  ;;  %v920_v61 = vld [vmem:[%s1189_s1 + $0x138] sm:$0xff]   ;;  %v33_v63 = vpack.c.bf16 %v26_v62, %v26_v62  ;;  %v614_v0 = vld [vmem:[%s1191_s3] sm:$0xff]  ;;  %v615_v1 = vld [vmem:[%s1191_s3 + $0x8] sm:$0xff]  ;;  %v699_v50 = vlaneseq  ;;  %s712_s14 = sshll.u32 %s955_s13, 4  ;;  %s713_s14 = int_to_ptr.vmem [resolvable:$true] %s712_s14 }
  0x34   :  { %827 = vmatprep.subr.bf16.mxu0 %v915_v51  ;;  %849 = vmatmul.mubr.msk.bf16.vlgmr.msra.gmra.mrb[4].mxu1 %vm435_vm1, %v35_v57  ;;  %v864_v2 = vpack.c.bf16 %v615_v1, %v614_v0  ;;  %v616_v4 = vld [vmem:[%s1191_s3 + $0x10] sm:$0xff]  ;;  %v617_v5 = vld [vmem:[%s1191_s3 + $0x18] sm:$0xff]  ;;  %v720_v8 = vld [vmem:[%s1190_s2] ss:$0 sm:$0xff]  ;;  %s928_s15 = scalar_lea.vmem %s713_s14, 128  ;;  %p933_p1 = scmp.lt.s32.totalorder %s713_s14, %s713_s14 }
  0x35   :  { %860 = vmatprep.mubr.msk.f32.mxu1 %vm953_vm0, %v952_v44  ;;  %v867_v6 = vpack.c.bf16 %v617_v5, %v616_v4  ;;  %v771_v45 = vld [vmem:[%s1192_s4] ss:$0 sm:$0xff]  ;;  %v700_v51 = vand.u32 127, %v699_v50  ;;  %p929_p0 = scmp.ne.s32.totalorder %s713_s14, %s928_s15  ;;  %p934_p2 = scmp.lt.s32.totalorder %s928_s15, %s928_s15 }
  0x36   :  { %865 = vmatpush3.bf16.msra.mxu1 %v864_v2 }
  0x37   :  { %828 = vmatpush3.bf16.msra.mxu0 %v916_v56  ;;  %866 = vmatprep.subr.bf16.mxu1 %v954_v3  ;;  %vm701_vm4 = vcmp.lt.s32.totalorder %v700_v51, 8  ;;  %p935_p3 = por %p934_p2, %p933_p1 }
  0x38   :  { %829 = vmatprep.subr.bf16.mxu0 %v917_v58 }
  0x39   :  { %p936_p4 = pnand %p935_p3, %p929_p0 }
  0x3a   :  { %868 = vmatpush3.bf16.msra.mxu1 %v867_v6 }
  0x3b   :  { %830 = vmatpush3.bf16.msra.mxu0 %v918_v59 }
  0x3c   :  { %831 = vmatprep.subr.bf16.mxu0 %v919_v60 }
  0x3f   :  { %832 = vmatpush3.bf16.msra.mxu0 %v920_v61 }
  0x42   :  { %552 = vmatmul.mubr.bf16.vlgmr.msra.gmra.mrb[4].mxu0 %v33_v63 }
  0xf5   :  { %v789_v7 = vpop.f32.mrb[0].mxu0 }
  0xf6   :  { %v790_v9 = vpop.f32.mrb[1].mxu0 }
  0xf7   :  { %v791_v10 = vadd.f32 %v790_v9, %v789_v7  ;;  %v792_v11 = vpop.f32.mrb[2].mxu0  ;;  %v811_v12 = vpop.f32.mrb[0].mxu1 }
  0xf8   :  { %v793_v13 = vpop.f32.mrb[3].mxu0  ;;  %v812_v15 = vpop.f32.mrb[1].mxu1 }
  0xf9   :  { %v474_v14 = vadd.f32 %v791_v10, %v720_v8  ;;  %v813_v16 = vadd.f32 %v812_v15, %v811_v12  ;;  %v814_v17 = vpop.f32.mrb[2].mxu1 }
  0xfa   :  { %v815_v18 = vpop.f32.mrb[3].mxu1 }
  0xfb   :  { %v514_v19 = vadd.f32 %v813_v16, %v474_v14 }
 0x107   :  { %v593_v20 = vpop.f32.mrb[4].mxu1 }
 0x108   :  { %v850_v21 = vpop.f32.mrb[5].mxu1 }
 0x109   :  { %v596_v22 = vpop.f32.mrb[6].mxu1 }
 0x10a   :  { %v851_v23 = vpop.f32.mrb[7].mxu1 }
 0x115   :  { %v833_v24 = vpop.f32.mrb[4].mxu0 }
 0x116   :  { %v834_v25 = vpop.f32.mrb[5].mxu0 }
 0x117   :  { %v835_v26 = vadd.f32 %v834_v25, %v833_v24  ;;  %v836_v27 = vpop.f32.mrb[6].mxu0 }
 0x118   :  { %v837_v28 = vpop.f32.mrb[7].mxu0 }
 0x119   :  { %v554_v29 = vadd.f32 %v835_v26, %v514_v19 }
 0x11b   :  { %v594_v30 = vadd.f32 %v593_v20, %v554_v29 }
 0x11d   :  { %v600_v31 = vand.u32 2147483647, %v594_v30  ;;  %v599_v42 = vmax.f32 %v594_v30, 0.0 }
 0x11f   :  { %v601_v32 = vsub.f32 0.0, %v600_v31 }
 0x121   :  { %v602_v33 = vmul.f32 1.442695, %v601_v32 }
 0x123   :  { %922 = vpow2.f32 %v602_v33 }
 0x12d   :  { %v923_v34 = vpop.eup %922 }
 0x12e   :  { %v604_v35 = vadd.f32 1.0, %v923_v34  ;;  %v607_v36 = vmul.f32 -0.5, %v923_v34  ;;  %v610_v38 = vand.u32 2147483647, %v923_v34 }
 0x130   :  { %924 = vlog2.f32 %v604_v35  ;;  %v608_v37 = vadd.f32 1.0, %v607_v36  ;;  %vm611_vm2 = vcmp.lt.f32.partialorder %v610_v38, 0.0004427343 }
 0x132   :  { %v609_v41 = vmul.f32 %v923_v34, %v608_v37 }
 0x13a   :  { %v925_v39 = vpop.eup %924 }
 0x13b   :  { %v606_v40 = vmul.f32 0.6931472, %v925_v39 }
 0x13d   :  { %v612_v43 = vsel %vm611_vm2, %v609_v41, %v606_v40 }
 0x13e   :  { %v613_v44 = vadd.f32 %v612_v43, %v599_v42 }
 0x140   :  { %861 = vmatmul.mubr.msk.f32.vlgmr.msra.gmra.mrb[8].mxu1 %vm625_vm3, %v613_v44 }
 0x213   :  { %v695_v46 = vpop.f32.mrb[8].mxu1 }
 0x214   :  { %v696_v47 = vadd.f32 %v771_v45, %v695_v46  ;;  %v862_v48 = vpop.f32.mrb[9].mxu1 }
 0x216   :  { %v702_v49 = vmul.f32 1.442695, %v696_v47 }
 0x218   :  { %926 = vpow2.f32 %v702_v49 }
 0x222   :  { %v927_v52 = vpop.eup %926 }
 0x223   :  { %v704_v53 = vsel %vm701_vm4, %v696_v47, %v927_v52 }
 0x224   :  { %705 = vst.msk [vmem:[#allocation2] sm:$0xff] %vm435_vm1, %v704_v53 }
 0x225   :  { %939 = shalt.err (!%p936_p4)
}
 0x226   :  { %s940_s17 = scalar_lea.hbm %s1193_s5, 128 }
 0x227   :  { %p941_p5 = scmp.ne.s32.totalorder %s1193_s5, %s940_s17  ;;  %p944_p6 = scmp.lt.u32.totalorder %s940_s17, %s1193_s5 }
 0x229   :  { %p946_p7 = pnand %p944_p6, %p941_p5 }
 0x22b   :  { %949 = shalt.err (!%p946_p7)
}
 0x22c   :  { %715 = dma.vmem_to_hbm [thread:$0]  %s713_s14, 128, %s1193_s5, [#allocation3]  }
 0x22d   :  { %950 = dma.done.wait [#allocation3], 128  }
 0x22e   :  { %951 = vsyncadd [#allocation3], 4294967168 }
 0x22f   :  { %719 = vsyncpa [#allocation3], 1 }

</bundles_post_ra>
